<compile_context>
chip_gen: v7x
topology: tpu7x:2x2x1
jax: 0.10.0
libtpu: 0.0.40
codegen_flags: <defaults>
</compile_context>

<pallas_src>
import math

import jax
import jax.numpy as jnp
import numpy as np
from jax.experimental import pallas as pl
from jax.experimental.pallas import tpu as pltpu


def _channel_mask(mode: str, c: int, p: float, w: float) -> np.ndarray:
    """Per-channel multiplier implied by spilt_att.forward (mask depends only on channel).

    Slicing mirrors the PyTorch code exactly (including the `-cc:` behaviour when cc == 0).
    """
    m = np.zeros((c,), dtype=np.float32)
    if mode == '0110':
        cc = int(c * (1 - p) // 2)
        half = np.ones((c // 2,), dtype=np.float32)
        half[:cc] = 0.0
        half1 = np.zeros((c // 2,), dtype=np.float32)
        half1[:c // 2 - cc] = 1.0
        m = np.concatenate([half, half1])
    elif mode == '1100':
        cc = int(c * p)
        m[:cc] = 1.0
    elif mode == '0011':
        cc = int(c * p)
        m[-cc:] = 1.0
        m[:c - cc] = w
    elif mode == '1010':
        cc = int(c * p // 2)
        m[:cc] = 1.0
        m[c // 2:c // 2 + cc] = 1.0
    elif mode == '0101':
        cc = int(c * (1 - p) // 2)
        m[:] = 1.0
        m[:cc] = 0.0
        m[c // 2:c // 2 + cc] = 0.0
    elif mode == '1001':
        cc = int(c * p // 2)
        m[:cc] = 1.0
        m[-cc:] = 1.0
    else:
        # TODO(synk): PyTorch forward returns None for unknown modes; we raise instead.
        raise ValueError(f"unsupported mode {mode!r}")
    return m


def _spilt_att_kernel(x_ref, m_ref, o_ref):
    # Elementwise hot path: each row of the (row_tile, lane_tile) block is one
    # (b, c) slice flattened over H*W; multiply by its per-channel scalar,
    # broadcast along the lane dimension.  Pure VPU work; memory-bound.
    o_ref[...] = x_ref[...] * m_ref[...]


def _round_down(x: int, m: int) -> int:
    return (x // m) * m


def _block_vmem_bytes(r: int, l: int, itemsize: int) -> int:
    """VMEM footprint of one (r, l) data block plus its (r, 1) mask block,
    including (8, 128) layout padding."""
    rp = ((r + 7) // 8) * 8
    lp = ((l + 127) // 128) * 128
    return rp * (lp + 128) * itemsize


def _choose_tiles(rows: int, lanes: int, itemsize: int,
                  target_bytes: int) -> tuple[int, int]:
    """Pick (row_tile, lane_tile) for the (rows, lanes) = (B*C, H*W) view.

    Row tiles are multiples of 8 (sublane constraint) unless full; lane tiles
    are multiples of 128 unless full.  Prefers full-lane (lane-dense) blocks.
    """
    if _block_vmem_bytes(rows, lanes, itemsize) <= target_bytes:
        return rows, lanes                           # single block

    # Full lanes, grow rows in multiples of 8 to fill the budget.
    per8 = _block_vmem_bytes(8, lanes, itemsize)
    if per8 <= target_bytes:
        k = max(1, target_bytes // per8)
        row_tile = min(8 * int(k), _round_down(rows, 8))
        row_tile = max(row_tile, 8)
        return row_tile, lanes

    # Even an 8-row strip of full lanes blows the budget: tile lanes too.
    row_tile = 8 if rows >= 8 else rows
    k = max(1, (target_bytes // (8 * itemsize) - 128) // 128)
    lane_tile = min(128 * int(k), _round_down(lanes, 128))
    lane_tile = max(lane_tile, min(lanes, 128))
    return row_tile, lane_tile


def spilt_att_pallas(x: jax.Array, mode: str, p: float = 0.5, w: float = 0.1,
                     target_block_bytes: int = 4 * 1024 * 1024) -> jax.Array:
    """x: (B, C, H, W), NCHW (PyTorch convention). Returns same shape/dtype."""
    b, c, h, wd = x.shape
    rows = b * c
    lanes = h * wd
    itemsize = jnp.dtype(x.dtype).itemsize

    row_tile, lane_tile = _choose_tiles(rows, lanes, itemsize, target_block_bytes)

    # Per-row mask (one scalar per (b, c) row), tiny: B*C elements total.
    mask_c = _channel_mask(mode, c, p, w)
    mask_rows = jnp.asarray(np.tile(mask_c, b).reshape(rows, 1), dtype=x.dtype)

    # Contiguous reshape: no data movement, no padding pass over HBM.
    x2 = x.reshape(rows, lanes)

    grid = (int(pl.cdiv(rows, row_tile)), int(pl.cdiv(lanes, lane_tile)))

    out = pl.pallas_call(
        _spilt_att_kernel,
        out_shape=jax.ShapeDtypeStruct((rows, lanes), x.dtype),
        grid_spec=pltpu.PrefetchScalarGridSpec(
            num_scalar_prefetch=0,
            grid=grid,
            in_specs=[
                pl.BlockSpec((row_tile, lane_tile), lambda i, j: (i, j)),
                # Mask block tracks the same row range as the x block; its
                # per-step DMA is row_tile*itemsize bytes (negligible).
                pl.BlockSpec((row_tile, 1), lambda i, j: (i, 0)),
            ],
            out_specs=pl.BlockSpec((row_tile, lane_tile), lambda i, j: (i, j)),
        ),
        compiler_params=pltpu.CompilerParams(
            dimension_semantics=("parallel", "parallel"),
            vmem_limit_bytes=32 * 1024 * 1024),
        cost_estimate=pl.CostEstimate(
            flops=rows * lanes,
            transcendentals=0,
            bytes_accessed=(2 * rows * lanes + rows) * itemsize),
    )(x2, mask_rows)

    return out.reshape(b, c, h, wd)


def spilt_att_ref(x: jax.Array, mode: str, p: float = 0.5, w: float = 0.1) -> jax.Array:
    b, c, h, wd = x.shape
    mask_c = jnp.asarray(_channel_mask(mode, c, p, w), dtype=x.dtype).reshape(1, c, 1, 1)
    return x * mask_c


if __name__ == "__main__":
    key = jax.random.PRNGKey(0)
    B, C, H, W = 2, 4, 16, 16
    x = jax.random.normal(key, (B, C, H, W), dtype=jnp.float32)

    p, w = 0.5, 0.1
    for mode in ("0011", "0110", "1100", "1010", "0101", "1001"):
        out = jax.block_until_ready(spilt_att_pallas(x, mode, p=p, w=w))
        ref = spilt_att_ref(x, mode, p=p, w=w)
        np.testing.assert_allclose(np.asarray(out), np.asarray(ref),
                                   rtol=1e-6, atol=1e-6)

    print("KERNEL_OK")
</pallas_src>

<mosaic_0001>
module attributes {stable_mosaic.version = 11 : i64} {
  func.func @_spilt_att_kernel(%arg0: i32, %arg1: i32, %arg2: memref<8x256xf32, #tpu.memory_space<vmem>>, %arg3: memref<8x1xf32, #tpu.memory_space<vmem>>, %arg4: memref<8x256xf32, #tpu.memory_space<vmem>>) attributes {dimension_semantics = [#tpu.dimension_semantics<parallel>, #tpu.dimension_semantics<parallel>], iteration_bounds = array<i64: 1, 1>, scalar_prefetch = 0 : i64, scratch_operands = 0 : i64, tpu.core_type = #tpu.core_type<tc>, window_params = [{transform_indices = @transform_0, window_bounds = array<i64: 8, 256>}, {transform_indices = @transform_1, window_bounds = array<i64: 8, 1>}, {transform_indices = @transform_2, window_bounds = array<i64: 8, 256>}]} {
    %c0 = arith.constant 0 : index
    %c0_0 = arith.constant 0 : index
    %0 = vector.load %arg2[%c0, %c0_0] : memref<8x256xf32, #tpu.memory_space<vmem>>, vector<8x256xf32>
    %c0_1 = arith.constant 0 : index
    %c0_2 = arith.constant 0 : index
    %1 = vector.load %arg3[%c0_1, %c0_2] : memref<8x1xf32, #tpu.memory_space<vmem>>, vector<8x1xf32>
    %2 = vector.broadcast %1 : vector<8x1xf32> to vector<8x256xf32>
    %3 = arith.mulf %0, %2 : vector<8x256xf32>
    %c0_3 = arith.constant 0 : index
    %c0_4 = arith.constant 0 : index
    %4 = vector.load %arg4[%c0_3, %c0_4] : memref<8x256xf32, #tpu.memory_space<vmem>>, vector<8x256xf32>
    tpu.vector_store %arg4[%c0_3, %c0_4], %3 {strides = array<i32>} : memref<8x256xf32, #tpu.memory_space<vmem>>, vector<8x256xf32>,
    return
  }
  func.func @transform_0(%arg0: i32, %arg1: i32) -> (i32, i32) {
    %c0_i32 = arith.constant 0 : i32
    return %arg0, %arg1 : i32, i32
  }
  func.func @transform_1(%arg0: i32, %arg1: i32) -> (i32, i32) {
    %c0_i32 = arith.constant 0 : i32
    %c0_i32_0 = arith.constant 0 : i32
    return %arg0, %c0_i32 : i32, i32
  }
  func.func @transform_2(%arg0: i32, %arg1: i32) -> (i32, i32) {
    %c0_i32 = arith.constant 0 : i32
    return %arg0, %arg1 : i32, i32
  }
}

</mosaic_0001>

<bundles_post_ra>
// kernel: tpu_custom_call.1
= control target key start
LH: loop header
LB: loop body
LE: loop exit
PB: predicated region body
PF: predicated region fallthrough
CT: control target
= control target key end

     0   :  { %7 = vsyncpa [#allocation3], 0  ;;  %s148_s0 = inlined_call_operand.hbm [shape: f32[8,256], index: 0, kind: input, shape index: {}]   ;;  %s149_s1 = inlined_call_operand.vmem [shape: f32[8,1], index: 1, kind: input, shape index: {}]   ;;  %s150_s2 = inlined_call_operand.hbm [shape: f32[8,256], index: 2, kind: output, shape index: {}]  }
   0x1   :  { %8 = vsyncpa [#allocation4], 0  ;;  %s103_s9 = smov [#allocation2]   ;;  %s55_s13 = scalar_lea.hbm %s148_s0, 256 }
   0x2   :  { %s15_s10 = sshll.u32 %s103_s9, 4  ;;  %p56_p0 = scmp.ne.s32.totalorder %s148_s0, %s55_s13  ;;  %s16_s10 = int_to_ptr.vmem [resolvable:$true] %s15_s10 }
   0x3   :  { %p59_p1 = scmp.lt.u32.totalorder %s55_s13, %s148_s0 }
   0x5   :  { %p61_p2 = pnand %p59_p1, %p56_p0 }
   0x7   :  { %64 = shalt.err (!%p61_p2)
}
   0x8   :  { %s65_s18 = scalar_lea.vmem %s16_s10, 256  ;;  %p70_p4 = scmp.lt.s32.totalorder %s16_s10, %s16_s10 }
   0x9   :  { %p66_p3 = scmp.ne.s32.totalorder %s16_s10, %s65_s18  ;;  %p71_p5 = scmp.lt.s32.totalorder %s65_s18, %s65_s18 }
   0xb   :  { %p72_p6 = por %p71_p5, %p70_p4 }
   0xd   :  { %p73_p7 = pnand %p72_p6, %p66_p3 }
   0xf   :  { %76 = shalt.err (!%p73_p7)
}
  0x10   :  { %18 = dma.hbm_to_vmem [thread:$0]  %s148_s0, 256, %s16_s10, [#allocation3]  }
  0x11   :  { %99 = dma.done.wait [#allocation3], 256  }
  0x12   :  { %100 = vsyncadd [#allocation3], 4294967040  ;;  %v104_v0 = vmov 0   ;;  %v26_v1 = vld [vmem:[%s149_s1] sm:$0xff]  ;;  %v25_v3 = vld [vmem:[#allocation2 + $0x8] sm:$0xff]  ;;  %s105_s23 = smov [#allocation5]  }
  0x13   :  { %54 = vset.pattern.permute.xlu0 %v104_v0  ;;  %v24_v2 = vld [vmem:[#allocation2] sm:$0xff]  ;;  %s42_s24 = sshll.u32 %s105_s23, 4  ;;  %s43_s24 = int_to_ptr.vmem [resolvable:$true] %s42_s24 }
  0x14   :  { %29 = vperm.xlu0 %54, %v26_v1   ;;  %s77_s0 = scalar_lea.vmem %s43_s24, 256  ;;  %p82_p9 = scmp.lt.s32.totalorder %s43_s24, %s43_s24 }
  0x15   :  { %p78_p8 = scmp.ne.s32.totalorder %s43_s24, %s77_s0  ;;  %p83_p10 = scmp.lt.s32.totalorder %s77_s0, %s77_s0 }
  0x17   :  { %p84_p11 = por %p83_p10, %p82_p9 }
  0x19   :  { %p85_p12 = pnand %p84_p11, %p78_p8 }
  0x93   :  { %v30_v4 = vpop.permute.xlu0 %29 }
  0x94   :  { %v32_v5 = vmul.f32 %v30_v4, %v24_v2  ;;  %v33_v6 = vmul.f32 %v30_v4, %v25_v3 }
  0x96   :  { %34 = vst [vmem:[#allocation5] sm:$0xff] %v32_v5  ;;  %35 = vst [vmem:[#allocation5 + $0x8] sm:$0xff] %v33_v6 }
  0x97   :  { %88 = shalt.err (!%p85_p12)
}
  0x98   :  { %s89_s26 = scalar_lea.hbm %s150_s2, 256 }
  0x99   :  { %p90_p13 = scmp.ne.s32.totalorder %s150_s2, %s89_s26  ;;  %p93_p0 = scmp.lt.u32.totalorder %s89_s26, %s150_s2 }
  0x9b   :  { %p95_p1 = pnand %p93_p0, %p90_p13 }
  0x9d   :  { %98 = shalt.err (!%p95_p1)
}
  0x9e   :  { %45 = dma.vmem_to_hbm [thread:$0]  %s43_s24, 256, %s150_s2, [#allocation4]  }
  0x9f   :  { %101 = dma.done.wait [#allocation4], 256  }
  0xa0   :  { %102 = vsyncadd [#allocation4], 4294967040 }
  0xa1   :  { %49 = vsyncpa [#allocation3], 1 }
  0xa2   :  { %50 = vsyncpa [#allocation4], 1 }

</bundles_post_ra>
